<compile_context>
chip_gen: v7x
topology: tpu7x:2x2x1
jax: 0.10.0
libtpu: 0.0.40
codegen_flags: <defaults>
</compile_context>

<pallas_src>
import jax
import jax.numpy as jnp
from jax import lax
from jax.experimental import pallas as pl
from jax.experimental.pallas import tpu as pltpu


def _round_up(x, m):
    return ((x + m - 1) // m) * m


def _cdiv(a, b):
    return (a + b - 1) // b


def _vmem_capacity_bytes():
    """Physical VMEM per TensorCore (64 MiB on v7x, 128 MiB on v5e/v6e)."""
    try:
        info = pltpu.get_tpu_info()
        cap = getattr(info, "vmem_capacity_bytes", None)
        if cap:
            return int(cap)
    except Exception:
        pass
    return 64 << 20  # conservative default (v7x per-TC)


def _make_mlp_kernel(n_sub, sub_h):
    """Fused fc1 -> erf-GELU -> fc2 over one hidden chunk.

    The hidden chunk is split into `n_sub` static sub-chunks so the MXU matmul
    of sub-chunk j+1 can be co-issued with the GELU VPU/EUP work of sub-chunk j.
    """

    def kernel(x_ref, w1_ref, b1_ref, w2_ref, b2_ref, o_ref, acc_ref):
        # x_ref:  (TM, Cin)    w1_ref: (Cin, TH)   b1_ref: (1, TH)
        # w2_ref: (TH, Cout)   b2_ref: (1, Cout)   o_ref:  (TM, Cout)
        # acc_ref: (TM, Cout) f32 scratch, accumulated over the hidden (k) axis.
        k = pl.program_id(1)
        x = x_ref[...]                           # load once, reuse per sub-chunk

        psum = None
        for j in range(n_sub):                   # static unroll
            lo = j * sub_h
            hi = lo + sub_h
            # fc1 sub-chunk: native-dtype operands into the MXU, f32 accumulate.
            h = jnp.dot(x, w1_ref[:, lo:hi], preferred_element_type=jnp.float32)
            h = h + b1_ref[:, lo:hi].astype(jnp.float32)
            # Exact (erf) GELU, matching torch.nn.GELU default.
            h = 0.5 * h * (1.0 + lax.erf(h * 0.7071067811865476))
            # fc2 sub-chunk: feed the MXU in the weight dtype, accumulate in f32.
            p = jnp.dot(h.astype(w2_ref.dtype), w2_ref[lo:hi, :],
                        preferred_element_type=jnp.float32)
            psum = p if psum is None else psum + p

        @pl.when(k == 0)
        def _():
            acc_ref[...] = psum                  # direct write: saves a f32 RMW pass

        @pl.when(k != 0)
        def _():
            acc_ref[...] += psum

        @pl.when(k == pl.num_programs(1) - 1)
        def _():
            o_ref[...] = (acc_ref[...] + b2_ref[...].astype(jnp.float32)
                          ).astype(o_ref.dtype)

    return kernel


def _pad2d(a, rows, cols):
    r, c = a.shape
    if r == rows and c == cols:
        return a                                 # already aligned -> no HBM copy
    return jnp.pad(a, ((0, rows - r), (0, cols - c)))


def mlp_pallas(x, w1, b1, w2, b2, *, tile_m=None, tile_h=None):
    """Forward of Mlp (dropout p=0 -> identity).

    x:  (..., C_in)                  activations (torch Linear acts on last dim)
    w1: (C_in, H),  b1: (H,)         fc1 weight stored pre-transposed (W.T)
    w2: (H, C_out), b2: (C_out,)     fc2 weight stored pre-transposed (W.T)
    """
    orig_shape = x.shape
    c_in = orig_shape[-1]
    hidden = w1.shape[1]
    c_out = w2.shape[1]
    assert w1.shape[0] == c_in and w2.shape[0] == hidden
    assert b1.shape == (hidden,) and b2.shape == (c_out,)

    x2d = x.reshape(-1, c_in)
    m = x2d.shape[0]
    out_dtype = x.dtype

    # Per-operand byte sizes (weights may be a different dtype than activations).
    bpe_x = jnp.dtype(x.dtype).itemsize
    bpe_w1 = jnp.dtype(w1.dtype).itemsize
    bpe_w2 = jnp.dtype(w2.dtype).itemsize
    bpe_b1 = jnp.dtype(b1.dtype).itemsize
    bpe_b2 = jnp.dtype(b2.dtype).itemsize
    bpe_o = jnp.dtype(out_dtype).itemsize

    # ---- lane-aligned padded feature dims ------------------------------------
    c_in_p = _round_up(c_in, 128)
    c_out_p = _round_up(c_out, 128)

    # ---- per-generation VMEM budget -------------------------------------------
    vmem_cap = _vmem_capacity_bytes()
    budget = int(vmem_cap * 0.7)       # headroom for compiler-internal scratch

    if tile_h is None:
        tile_h = min(1024, _round_up(hidden, 128))
    tile_h = _round_up(tile_h, 128)

    m_aligned = _round_up(max(m, 1), 8)
    if tile_m is None:
        # Biggest M tile that fits: weight HBM traffic scales as 1/tile_m.
        tile_m = min(2048, m_aligned)
        # Keep grid_m >= 2 when the problem is big enough so the "parallel" M
        # axis actually splits across both TensorCores on dual-TC chips (v7x).
        if m_aligned > 1024:
            tile_m = min(tile_m, max(512, _round_up(_cdiv(m_aligned, 2), 8)))
    tile_m = _round_up(min(tile_m, m_aligned), 8)

    def footprint(tm, th):
        return (2 * tm * c_in_p * bpe_x          # x tiles (double buffered)
                + 2 * c_in_p * th * bpe_w1       # w1 tiles
                + 2 * 8 * th * bpe_b1            # b1 tiles (sublane padded)
                + 2 * th * c_out_p * bpe_w2      # w2 tiles
                + 2 * 8 * c_out_p * bpe_b2       # b2 tiles
                + 2 * tm * c_out_p * bpe_o       # out tiles
                + 4 * tm * c_out_p)              # f32 accumulator scratch

    while tile_m > 8 and footprint(tile_m, tile_h) > budget:
        tile_m = _round_up(max(8, tile_m // 2), 8)
    while tile_h > 128 and footprint(tile_m, tile_h) > budget:
        tile_h = _round_up(max(128, tile_h // 2), 128)

    h_p = _round_up(hidden, tile_h)
    m_p = _round_up(m, tile_m)
    grid_m = m_p // tile_m
    grid_k = h_p // tile_h

    # Sub-chunk the hidden tile so fc1(j+1) (MXU) overlaps GELU(j) (VPU/EUP).
    if tile_h >= 256 and tile_h % 256 == 0:
        n_sub, sub_h = 2, tile_h // 2
    else:
        n_sub, sub_h = 1, tile_h

    # ---- zero-pad operands only when needed (padding contributes exactly 0) --
    x_p = _pad2d(x2d, m_p, c_in_p)
    w1_p = _pad2d(w1, c_in_p, h_p)
    b1_p = _pad2d(b1.reshape(1, hidden), 1, h_p)
    w2_p = _pad2d(w2, h_p, c_out_p)
    b2_p = _pad2d(b2.reshape(1, c_out), 1, c_out_p)

    fp = footprint(tile_m, tile_h)
    vmem_limit = int(min(vmem_cap - (4 << 20),
                         max(int(fp * 1.4) + (2 << 20), 32 << 20)))
    vmem_limit = max(vmem_limit, int(fp * 1.2))

    kernel = _make_mlp_kernel(n_sub, sub_h)

    out_p = pl.pallas_call(
        kernel,
        out_shape=jax.ShapeDtypeStruct((m_p, c_out_p), out_dtype),
        grid=(grid_m, grid_k),
        in_specs=[
            pl.BlockSpec((tile_m, c_in_p), lambda i, k: (i, 0)),   # x stays per M tile
            pl.BlockSpec((c_in_p, tile_h), lambda i, k: (0, k)),   # w1 streamed over k
            pl.BlockSpec((1, tile_h), lambda i, k: (0, k)),        # b1 chunk
            pl.BlockSpec((tile_h, c_out_p), lambda i, k: (k, 0)),  # w2 streamed over k
            pl.BlockSpec((1, c_out_p), lambda i, k: (0, 0)),       # b2 resident
        ],
        out_specs=pl.BlockSpec((tile_m, c_out_p), lambda i, k: (i, 0)),
        scratch_shapes=[pltpu.VMEM((tile_m, c_out_p), jnp.float32)],
        compiler_params=pltpu.CompilerParams(
            dimension_semantics=("parallel", "arbitrary"),
            vmem_limit_bytes=vmem_limit),
    )(x_p, w1_p, b1_p, w2_p, b2_p)

    out2d = out_p if (m_p == m and c_out_p == c_out) else out_p[:m, :c_out]
    return out2d.reshape(*orig_shape[:-1], c_out)


def _reference_mlp(x, w1, b1, w2, b2):
    h = jnp.einsum("...i,ih->...h", x.astype(jnp.float32),
                   w1.astype(jnp.float32)) + b1.astype(jnp.float32)
    h = jax.nn.gelu(h, approximate=False)
    y = jnp.einsum("...h,ho->...o", h, w2.astype(jnp.float32)) + b2.astype(jnp.float32)
    return y.astype(x.dtype)


if __name__ == "__main__":
    key = jax.random.PRNGKey(0)

    # ---- Test 1: small shapes consistent with the module (B, N, C_in) --------
    B, N = 2, 8
    in_features, hidden_features, out_features = 32, 64, 32
    kx, kw1, kb1, kw2, kb2, key = jax.random.split(key, 6)
    x = jax.random.normal(kx, (B, N, in_features), dtype=jnp.float32)
    # Parameters stored as (in, out), i.e. W.T of the torch Linear layers.
    w1 = jax.random.normal(kw1, (in_features, hidden_features), jnp.float32) * 0.02
    b1 = jax.random.normal(kb1, (hidden_features,), jnp.float32) * 0.01
    w2 = jax.random.normal(kw2, (hidden_features, out_features), jnp.float32) * 0.02
    b2 = jax.random.normal(kb2, (out_features,), jnp.float32) * 0.01

    out = jax.block_until_ready(mlp_pallas(x, w1, b1, w2, b2))
    ref = _reference_mlp(x, w1, b1, w2, b2)
    assert out.shape == (B, N, out_features), out.shape
    assert jnp.allclose(out, ref, atol=1e-5, rtol=1e-5), \
        float(jnp.max(jnp.abs(out - ref)))

    # ---- Test 2: exercises multi M-tile, multi k-step, sub-chunking & padding --
    B2, N2 = 2, 516
    in2, hid2, out2 = 256, 1536, 256
    kx, kw1, kb1, kw2, kb2, key = jax.random.split(key, 6)
    x_b = jax.random.normal(kx, (B2, N2, in2), dtype=jnp.float32)
    w1_b = jax.random.normal(kw1, (in2, hid2), jnp.float32) * 0.02
    b1_b = jax.random.normal(kb1, (hid2,), jnp.float32) * 0.01
    w2_b = jax.random.normal(kw2, (hid2, out2), jnp.float32) * 0.02
    b2_b = jax.random.normal(kb2, (out2,), jnp.float32) * 0.01

    out_b = jax.block_until_ready(mlp_pallas(x_b, w1_b, b1_b, w2_b, b2_b))
    ref_b = _reference_mlp(x_b, w1_b, b1_b, w2_b, b2_b)
    assert out_b.shape == (B2, N2, out2), out_b.shape
    assert jnp.allclose(out_b, ref_b, atol=2e-4, rtol=2e-4), \
        float(jnp.max(jnp.abs(out_b - ref_b)))

    print("KERNEL_OK")
</pallas_src>

<mosaic_0001>
module attributes {stable_mosaic.version = 11 : i64} {
  func.func @kernel(%arg0: i32, %arg1: i32, %arg2: memref<16x128xf32, #tpu.memory_space<vmem>>, %arg3: memref<128x128xf32, #tpu.memory_space<vmem>>, %arg4: memref<1x128xf32, #tpu.memory_space<vmem>>, %arg5: memref<128x128xf32, #tpu.memory_space<vmem>>, %arg6: memref<1x128xf32, #tpu.memory_space<vmem>>, %arg7: memref<16x128xf32, #tpu.memory_space<vmem>>, %arg8: memref<16x128xf32, #tpu.memory_space<vmem>>) attributes {dimension_semantics = [#tpu.dimension_semantics<parallel>, #tpu.dimension_semantics<arbitrary>], iteration_bounds = array<i64: 1, 1>, scalar_prefetch = 0 : i64, scratch_operands = 1 : i64, tpu.core_type = #tpu.core_type<tc>, window_params = [{transform_indices = @transform_0, window_bounds = array<i64: 16, 128>}, {transform_indices = @transform_1, window_bounds = array<i64: 128, 128>}, {transform_indices = @transform_2, window_bounds = array<i64: 1, 128>}, {transform_indices = @transform_3, window_bounds = array<i64: 128, 128>}, {pipeline_mode = #tpu.pipeline_mode<synchronous>, transform_indices = @transform_4, window_bounds = array<i64: 1, 128>}, {transform_indices = @transform_5, window_bounds = array<i64: 16, 128>}]} {
    %c0 = arith.constant 0 : index
    %c0_0 = arith.constant 0 : index
    %0 = vector.load %arg2[%c0, %c0_0] : memref<16x128xf32, #tpu.memory_space<vmem>>, vector<16x128xf32>
    %c0_1 = arith.constant 0 : index
    %c0_2 = arith.constant 0 : index
    %1 = vector.load %arg3[%c0_1, %c0_2] : memref<128x128xf32, #tpu.memory_space<vmem>>, vector<128x128xf32>
    %cst = arith.constant dense<0.000000e+00> : vector<16x128xf32>
    %2 = tpu.matmul %0, %1, %cst {dimension_numbers = #tpu.dot_dimension_numbers<[1], [0], [0], [1], [0, 0, 1, 1], [], []>} : vector<16x128xf32>, vector<128x128xf32>, vector<16x128xf32> -> vector<16x128xf32>
    %c0_3 = arith.constant 0 : index
    %c0_4 = arith.constant 0 : index
    %3 = vector.load %arg4[%c0_3, %c0_4] : memref<1x128xf32, #tpu.memory_space<vmem>>, vector<1x128xf32>
    %4 = vector.broadcast %3 : vector<1x128xf32> to vector<16x128xf32>
    %5 = arith.addf %2, %4 : vector<16x128xf32>
    %cst_5 = arith.constant 5.000000e-01 : f32
    %6 = vector.broadcast %cst_5 : f32 to vector<16x128xf32>
    %7 = arith.mulf %6, %5 : vector<16x128xf32>
    %cst_6 = arith.constant 0.707106769 : f32
    %8 = vector.broadcast %cst_6 : f32 to vector<16x128xf32>
    %9 = arith.mulf %5, %8 : vector<16x128xf32>
    %10 = math.erf %9 : vector<16x128xf32>
    %cst_7 = arith.constant 1.000000e+00 : f32
    %11 = vector.broadcast %cst_7 : f32 to vector<16x128xf32>
    %12 = arith.addf %11, %10 : vector<16x128xf32>
    %13 = arith.mulf %7, %12 : vector<16x128xf32>
    %c0_8 = arith.constant 0 : index
    %c0_9 = arith.constant 0 : index
    %14 = vector.load %arg5[%c0_8, %c0_9] : memref<128x128xf32, #tpu.memory_space<vmem>>, vector<128x128xf32>
    %cst_10 = arith.constant dense<0.000000e+00> : vector<16x128xf32>
    %15 = tpu.matmul %13, %14, %cst_10 {dimension_numbers = #tpu.dot_dimension_numbers<[1], [0], [0], [1], [0, 0, 1, 1], [], []>} : vector<16x128xf32>, vector<128x128xf32>, vector<16x128xf32> -> vector<16x128xf32>
    %c0_i32 = arith.constant 0 : i32
    %16 = arith.cmpi eq, %arg1, %c0_i32 : i32
    %17 = arith.extui %16 : i1 to i32
    %c0_i32_11 = arith.constant 0 : i32
    %18 = arith.cmpi ne, %17, %c0_i32_11 : i32
    scf.if %18 {
      %c0_16 = arith.constant 0 : index
      %c0_17 = arith.constant 0 : index
      %25 = vector.load %arg8[%c0_16, %c0_17] : memref<16x128xf32, #tpu.memory_space<vmem>>, vector<16x128xf32>
      tpu.vector_store %arg8[%c0_16, %c0_17], %15 {strides = array<i32>} : memref<16x128xf32, #tpu.memory_space<vmem>>, vector<16x128xf32>,
    } else {
    }
    %c0_i32_12 = arith.constant 0 : i32
    %19 = arith.cmpi ne, %arg1, %c0_i32_12 : i32
    %20 = arith.extui %19 : i1 to i32
    %c0_i32_13 = arith.constant 0 : i32
    %21 = arith.cmpi ne, %20, %c0_i32_13 : i32
    scf.if %21 {
      %c0_16 = arith.constant 0 : index
      %c0_17 = arith.constant 0 : index
      %25 = vector.load %arg8[%c0_16, %c0_17] : memref<16x128xf32, #tpu.memory_space<vmem>>, vector<16x128xf32>
      %26 = arith.addf %25, %15 : vector<16x128xf32>
      %c0_18 = arith.constant 0 : index
      %c0_19 = arith.constant 0 : index
      %27 = vector.load %arg8[%c0_18, %c0_19] : memref<16x128xf32, #tpu.memory_space<vmem>>, vector<16x128xf32>
      tpu.vector_store %arg8[%c0_18, %c0_19], %26 {strides = array<i32>} : memref<16x128xf32, #tpu.memory_space<vmem>>, vector<16x128xf32>,
    } else {
    }
    %c0_i32_14 = arith.constant 0 : i32
    %22 = arith.cmpi eq, %arg1, %c0_i32_14 : i32
    %23 = arith.extui %22 : i1 to i32
    %c0_i32_15 = arith.constant 0 : i32
    %24 = arith.cmpi ne, %23, %c0_i32_15 : i32
    scf.if %24 {
      %c0_16 = arith.constant 0 : index
      %c0_17 = arith.constant 0 : index
      %25 = vector.load %arg8[%c0_16, %c0_17] : memref<16x128xf32, #tpu.memory_space<vmem>>, vector<16x128xf32>
      %c0_18 = arith.constant 0 : index
      %c0_19 = arith.constant 0 : index
      %26 = vector.load %arg6[%c0_18, %c0_19] : memref<1x128xf32, #tpu.memory_space<vmem>>, vector<1x128xf32>
      %27 = vector.broadcast %26 : vector<1x128xf32> to vector<16x128xf32>
      %28 = arith.addf %25, %27 : vector<16x128xf32>
      %c0_20 = arith.constant 0 : index
      %c0_21 = arith.constant 0 : index
      %29 = vector.load %arg7[%c0_20, %c0_21] : memref<16x128xf32, #tpu.memory_space<vmem>>, vector<16x128xf32>
      tpu.vector_store %arg7[%c0_20, %c0_21], %28 {strides = array<i32>} : memref<16x128xf32, #tpu.memory_space<vmem>>, vector<16x128xf32>,
    } else {
    }
    return
  }
  func.func @transform_0(%arg0: i32, %arg1: i32) -> (i32, i32) {
    %c0_i32 = arith.constant 0 : i32
    %c0_i32_0 = arith.constant 0 : i32
    return %arg0, %c0_i32 : i32, i32
  }
  func.func @transform_1(%arg0: i32, %arg1: i32) -> (i32, i32) {
    %c0_i32 = arith.constant 0 : i32
    %c0_i32_0 = arith.constant 0 : i32
    return %c0_i32, %arg1 : i32, i32
  }
  func.func @transform_2(%arg0: i32, %arg1: i32) -> (i32, i32) {
    %c0_i32 = arith.constant 0 : i32
    %c0_i32_0 = arith.constant 0 : i32
    return %c0_i32, %arg1 : i32, i32
  }
  func.func @transform_3(%arg0: i32, %arg1: i32) -> (i32, i32) {
    %c0_i32 = arith.constant 0 : i32
    %c0_i32_0 = arith.constant 0 : i32
    return %arg1, %c0_i32 : i32, i32
  }
  func.func @transform_4(%arg0: i32, %arg1: i32) -> (i32, i32) {
    %c0_i32 = arith.constant 0 : i32
    %c0_i32_0 = arith.constant 0 : i32
    %c0_i32_1 = arith.constant 0 : i32
    return %c0_i32, %c0_i32_0 : i32, i32
  }
  func.func @transform_5(%arg0: i32, %arg1: i32) -> (i32, i32) {
    %c0_i32 = arith.constant 0 : i32
    %c0_i32_0 = arith.constant 0 : i32
    return %arg0, %c0_i32 : i32, i32
  }
}

</mosaic_0001>

<bundles_post_ra>
// kernel: tpu_custom_call.1
= control target key start
LH: loop header
LB: loop body
LE: loop exit
PB: predicated region body
PF: predicated region fallthrough
CT: control target
= control target key end

     0   :  { %10 = vsyncpa [#allocation4], 0  ;;  %s698_s0 = inlined_call_operand.hbm [shape: f32[16,128], index: 0, kind: input, shape index: {}]   ;;  %s699_s1 = inlined_call_operand.hbm [shape: f32[128,128], index: 1, kind: input, shape index: {}]   ;;  %s700_s2 = inlined_call_operand.vmem [shape: f32[1,128], index: 2, kind: input, shape index: {}]   ;;  %s701_s3 = inlined_call_operand.hbm [shape: f32[128,128], index: 3, kind: input, shape index: {}]   ;;  %s702_s4 = inlined_call_operand.vmem [shape: f32[1,128], index: 4, kind: input, shape index: {}]   ;;  %s703_s5 = inlined_call_operand.hbm [shape: f32[16,128], index: 5, kind: output, shape index: {}]  }
   0x1   :  { %11 = vsyncpa [#allocation7], 0 }
   0x2   :  { %12 = vsyncpa [#allocation5], 0  ;;  %s589_s18 = smov [#allocation6]   ;;  %s590_s20 = smov [#allocation3]  }
   0x3   :  { %s30_s19 = sshll.u32 %s589_s18, 4  ;;  %s18_s21 = sshll.u32 %s590_s20, 4  ;;  %s31_s19 = int_to_ptr.vmem [resolvable:$true] %s30_s19  ;;  %s625_s21 = int_to_ptr.vmem [resolvable:$true] %s18_s21 }
   0x4   :  { %s495_s24 = scalar_lea.hbm %s699_s1, 2048 }
   0x5   :  { %p496_p0 = scmp.ne.s32.totalorder %s699_s1, %s495_s24  ;;  %p499_p1 = scmp.lt.u32.totalorder %s495_s24, %s699_s1 }
   0x7   :  { %p501_p2 = pnand %p499_p1, %p496_p0 }
   0x9   :  { %504 = shalt.err (!%p501_p2)
}
   0xa   :  { %s505_s29 = scalar_lea.vmem %s31_s19, 2048  ;;  %p510_p4 = scmp.lt.s32.totalorder %s31_s19, %s31_s19 }
   0xb   :  { %p506_p3 = scmp.ne.s32.totalorder %s31_s19, %s505_s29  ;;  %p511_p5 = scmp.lt.s32.totalorder %s505_s29, %s505_s29 }
   0xd   :  { %p512_p6 = por %p511_p5, %p510_p4 }
   0xf   :  { %p513_p7 = pnand %p512_p6, %p506_p3 }
  0x11   :  { %516 = shalt.err (!%p513_p7)
}
  0x12   :  { %s591_s30 = smov 128   ;;  %s592_s6 = smov 8  }
  0x13   :  { %36 = dma.hbm_to_vmem [thread:$0]  %s699_s1, 2048, %s31_s19, [#allocation7], %s591_s30, %s591_s30, %s592_s6  }
  0x14   :  { %s517_s11 = scalar_lea.hbm %s698_s0, 256 }
  0x15   :  { %p518_p8 = scmp.ne.s32.totalorder %s698_s0, %s517_s11  ;;  %p521_p9 = scmp.lt.u32.totalorder %s517_s11, %s698_s0 }
  0x17   :  { %p523_p10 = pnand %p521_p9, %p518_p8 }
  0x19   :  { %526 = shalt.err (!%p523_p10)
}
  0x1a   :  { %s527_s16 = scalar_lea.vmem %s625_s21, 256  ;;  %p532_p12 = scmp.lt.s32.totalorder %s625_s21, %s625_s21 }
  0x1b   :  { %p528_p11 = scmp.ne.s32.totalorder %s625_s21, %s527_s16  ;;  %p533_p13 = scmp.lt.s32.totalorder %s527_s16, %s527_s16 }
  0x1d   :  { %p534_p0 = por %p533_p13, %p532_p12 }
  0x1f   :  { %p535_p1 = pnand %p534_p0, %p528_p11 }
  0x21   :  { %538 = shalt.err (!%p535_p1)
}
  0x22   :  { %24 = dma.hbm_to_vmem [thread:$0]  %s698_s0, 256, %s625_s21, [#allocation4], %s591_s30, %s591_s30, %s592_s6  }
  0x23   :  { %s593_s18 = smov [#allocation8]   ;;  %s539_s23 = scalar_lea.hbm %s701_s3, 2048 }
  0x24   :  { %s44_s19 = sshll.u32 %s593_s18, 4  ;;  %p540_p2 = scmp.ne.s32.totalorder %s701_s3, %s539_s23  ;;  %s45_s19 = int_to_ptr.vmem [resolvable:$true] %s44_s19 }
  0x25   :  { %p543_p3 = scmp.lt.u32.totalorder %s539_s23, %s701_s3 }
  0x27   :  { %p545_p4 = pnand %p543_p3, %p540_p2 }
  0x29   :  { %548 = shalt.err (!%p545_p4)
}
  0x2a   :  { %s549_s28 = scalar_lea.vmem %s45_s19, 2048  ;;  %p554_p6 = scmp.lt.s32.totalorder %s45_s19, %s45_s19 }
  0x2b   :  { %p550_p5 = scmp.ne.s32.totalorder %s45_s19, %s549_s28  ;;  %p555_p7 = scmp.lt.s32.totalorder %s549_s28, %s549_s28 }
  0x2d   :  { %p556_p8 = por %p555_p7, %p554_p6 }
  0x2f   :  { %p557_p9 = pnand %p556_p8, %p550_p5 }
  0x31   :  { %560 = shalt.err (!%p557_p9)
}
  0x32   :  { %50 = dma.hbm_to_vmem [thread:$0]  %s701_s3, 2048, %s45_s19, [#allocation7], %s591_s30, %s591_s30, %s592_s6  }
  0x33   :  { %583 = dma.done.wait [#allocation4], 256  }
  0x34   :  { %584 = vsyncadd [#allocation4], 4294967040 }
  0x35   :  { %585 = dma.done.wait [#allocation7], 4096  }
  0x36   :  { %586 = vsyncadd [#allocation7], 4294963200  ;;  %v64_v0 = vld [vmem:[#allocation6] sm:$0xff]  ;;  %v65_v1 = vld [vmem:[#allocation6 + $0x8] sm:$0xff]  ;;  %s594_s8 = smov [#allocation9]  }
  0x37   :  { %v66_v2 = vld [vmem:[#allocation6 + $0x10] sm:$0xff]  ;;  %v421_v3 = vpack.c.bf16 %v65_v1, %v64_v0  ;;  %v67_v4 = vld [vmem:[#allocation6 + $0x18] sm:$0xff]  ;;  %v68_v6 = vld [vmem:[#allocation6 + $0x20] sm:$0xff]  ;;  %s300_s9 = sshll.u32 %s594_s8, 4  ;;  %s301_s9 = int_to_ptr.vmem [resolvable:$true] %s300_s9 }
  0x38   :  { %v425_v5 = vpack.c.bf16 %v67_v4, %v66_v2  ;;  %v69_v7 = vld [vmem:[#allocation6 + $0x28] sm:$0xff]  ;;  %v70_v9 = vld [vmem:[#allocation6 + $0x30] sm:$0xff]  ;;  %v71_v10 = vld [vmem:[#allocation6 + $0x38] sm:$0xff]  ;;  %s561_s10 = scalar_lea.vmem %s301_s9, 256  ;;  %p566_p11 = scmp.lt.s32.totalorder %s301_s9, %s301_s9 }
  0x39   :  { %422 = vmatprep.subr.bf16.mxu0 %v421_v3  ;;  %v429_v8 = vpack.c.bf16 %v69_v7, %v68_v6  ;;  %v62_v11 = vld [vmem:[#allocation3] sm:$0xff]  ;;  %v172_v12 = vld [vmem:[#allocation8] sm:$0xff]  ;;  %v173_v13 = vld [vmem:[#allocation8 + $0x8] sm:$0xff]  ;;  %v433_v20 = vpack.c.bf16 %v71_v10, %v70_v9  ;;  %p562_p10 = scmp.ne.s32.totalorder %s301_s9, %s561_s10  ;;  %p567_p12 = scmp.lt.s32.totalorder %s561_s10, %s561_s10 }
  0x3a   :  { %424 = vmatpush3.bf16.msra.mxu0 %v421_v3  ;;  %383 = vmatprep.mubr.f32.mxu0 %v62_v11  ;;  %v174_v14 = vld [vmem:[#allocation8 + $0x10] sm:$0xff]  ;;  %v453_v15 = vpack.c.bf16 %v173_v13, %v172_v12  ;;  %v175_v16 = vld [vmem:[#allocation8 + $0x18] sm:$0xff]  ;;  %v176_v18 = vld [vmem:[#allocation8 + $0x20] sm:$0xff] }
  0x3b   :  { %426 = vmatprep.subr.bf16.mxu0 %v425_v5  ;;  %v457_v17 = vpack.c.bf16 %v175_v16, %v174_v14  ;;  %v177_v19 = vld [vmem:[#allocation8 + $0x28] sm:$0xff]  ;;  %v72_v21 = vld [vmem:[#allocation6 + $0x40] sm:$0xff]  ;;  %v74_v25 = vld [vmem:[#allocation6 + $0x50] sm:$0xff]  ;;  %p568_p13 = por %p567_p12, %p566_p11 }
  0x3c   :  { %454 = vmatprep.subr.bf16.mxu1 %v453_v15  ;;  %v73_v22 = vld [vmem:[#allocation6 + $0x48] sm:$0xff]  ;;  %v461_v23 = vpack.c.bf16 %v177_v19, %v176_v18  ;;  %v75_v26 = vld [vmem:[#allocation6 + $0x58] sm:$0xff]  ;;  %v76_v28 = vld [vmem:[#allocation6 + $0x60] sm:$0xff] }
  0x3d   :  { %456 = vmatpush3.bf16.msra.mxu1 %v453_v15  ;;  %v437_v24 = vpack.c.bf16 %v73_v22, %v72_v21  ;;  %v441_v27 = vpack.c.bf16 %v75_v26, %v74_v25  ;;  %v77_v29 = vld [vmem:[#allocation6 + $0x68] sm:$0xff]  ;;  %v78_v31 = vld [vmem:[#allocation6 + $0x70] sm:$0xff]  ;;  %v79_v32 = vld [vmem:[#allocation6 + $0x78] sm:$0xff]  ;;  %p569_p0 = pnand %p568_p13, %p562_p10 }
  0x3e   :  { %428 = vmatpush3.bf16.msra.mxu0 %v425_v5  ;;  %458 = vmatprep.subr.bf16.mxu1 %v457_v17  ;;  %v445_v30 = vpack.c.bf16 %v77_v29, %v76_v28  ;;  %v449_v33 = vpack.c.bf16 %v79_v32, %v78_v31  ;;  %v63_v34 = vld [vmem:[#allocation3 + $0x8] sm:$0xff]  ;;  %v178_v35 = vld [vmem:[#allocation8 + $0x30] sm:$0xff]  ;;  %v180_v38 = vld [vmem:[#allocation8 + $0x40] sm:$0xff] }
  0x3f   :  { %430 = vmatprep.subr.bf16.mxu0 %v429_v8  ;;  %v179_v36 = vld [vmem:[#allocation8 + $0x38] sm:$0xff]  ;;  %v181_v39 = vld [vmem:[#allocation8 + $0x48] sm:$0xff]  ;;  %v182_v41 = vld [vmem:[#allocation8 + $0x50] sm:$0xff] }
  0x40   :  { %v465_v37 = vpack.c.bf16 %v179_v36, %v178_v35  ;;  %v469_v40 = vpack.c.bf16 %v181_v39, %v180_v38  ;;  %v183_v42 = vld [vmem:[#allocation8 + $0x58] sm:$0xff]  ;;  %v184_v44 = vld [vmem:[#allocation8 + $0x60] sm:$0xff]  ;;  %v185_v45 = vld [vmem:[#allocation8 + $0x68] sm:$0xff] }
  0x41   :  { %460 = vmatpush3.bf16.msra.mxu1 %v457_v17  ;;  %v473_v43 = vpack.c.bf16 %v183_v42, %v182_v41  ;;  %v477_v46 = vpack.c.bf16 %v185_v45, %v184_v44  ;;  %v186_v47 = vld [vmem:[#allocation8 + $0x70] sm:$0xff]  ;;  %v187_v48 = vld [vmem:[#allocation8 + $0x78] sm:$0xff] }
  0x42   :  { %432 = vmatpush3.bf16.msra.mxu0 %v429_v8  ;;  %462 = vmatprep.subr.bf16.mxu1 %v461_v23  ;;  %v481_v49 = vpack.c.bf16 %v187_v48, %v186_v47  ;;  %v313_v50 = vld [vmem:[%s700_s2] ss:$0 sm:$0xff] }
  0x43   :  { %434 = vmatprep.subr.bf16.mxu0 %v433_v20  ;;  %v314_v1 = vld [vmem:[%s702_s4] ss:$0 sm:$0xff] }
  0x45   :  { %464 = vmatpush3.bf16.msra.mxu1 %v461_v23 }
  0x46   :  { %436 = vmatpush3.bf16.msra.mxu0 %v433_v20  ;;  %466 = vmatprep.subr.bf16.mxu1 %v465_v37 }
  0x47   :  { %438 = vmatprep.subr.bf16.mxu0 %v437_v24 }
  0x49   :  { %468 = vmatpush3.bf16.msra.mxu1 %v465_v37 }
  0x4a   :  { %440 = vmatpush3.bf16.msra.mxu0 %v437_v24  ;;  %470 = vmatprep.subr.bf16.mxu1 %v469_v40 }
  0x4b   :  { %442 = vmatprep.subr.bf16.mxu0 %v441_v27 }
  0x4d   :  { %472 = vmatpush3.bf16.msra.mxu1 %v469_v40 }
  0x4e   :  { %444 = vmatpush3.bf16.msra.mxu0 %v441_v27  ;;  %474 = vmatprep.subr.bf16.mxu1 %v473_v43 }
  0x4f   :  { %446 = vmatprep.subr.bf16.mxu0 %v445_v30 }
  0x51   :  { %476 = vmatpush3.bf16.msra.mxu1 %v473_v43 }
  0x52   :  { %448 = vmatpush3.bf16.msra.mxu0 %v445_v30  ;;  %478 = vmatprep.subr.bf16.mxu1 %v477_v46 }
  0x53   :  { %450 = vmatprep.subr.bf16.mxu0 %v449_v33 }
  0x55   :  { %480 = vmatpush3.bf16.msra.mxu1 %v477_v46 }
  0x56   :  { %452 = vmatpush3.bf16.msra.mxu0 %v449_v33  ;;  %482 = vmatprep.subr.bf16.mxu1 %v481_v49 }
  0x59   :  { %384 = vmatmul.mubr.f32.vlgmr.msra.gmra.mrb[0].mxu0 %v63_v34  ;;  %484 = vmatpush3.bf16.msra.mxu1 %v481_v49 }
 0x12c   :  { %v385_v51 = vpop.f32.mrb[0].mxu0 }
 0x12d   :  { %v159_v52 = vadd.f32 %v385_v51, %v313_v50  ;;  %v153_v53 = vpop.f32.mrb[1].mxu0 }
 0x12e   :  { %v154_v54 = vadd.f32 %v313_v50, %v153_v53 }
 0x12f   :  { %v165_v55 = vmul.f32 0.70710677, %v159_v52  ;;  %v163_v62 = vmul.f32 0.5, %v159_v52 }
 0x130   :  { %v164_v56 = vmul.f32 0.70710677, %v154_v54  ;;  %v162_v60 = vmul.f32 0.5, %v154_v54 }
 0x131   :  { %491 = verf.f32 %v165_v55 }
 0x132   :  { %493 = verf.f32 %v164_v56 }
 0x13b   :  { %v492_v57 = vpop.eup %491 }
 0x13c   :  { %v494_v58 = vpop.eup %493  ;;  %v169_v59 = vadd.f32 1.0, %v492_v57 }
 0x13d   :  { %v168_v61 = vadd.f32 1.0, %v494_v58 }
 0x13e   :  { %v171_v0 = vmul.f32 %v169_v59, %v163_v62 }
 0x13f   :  { %v170_v63 = vmul.f32 %v168_v61, %v162_v60 }
 0x141   :  { %418 = vmatprep.mubr.f32.mxu1 %v170_v63 }
 0x142   :  { %419 = vmatmul.mubr.f32.vlgmr.msra.gmra.mrb[0].mxu1 %v171_v0 }
 0x215   :  { %v420_v2 = vpop.f32.mrb[0].mxu1 }
 0x216   :  { %v292_v3 = vadd.f32 %v420_v2, %v314_v1  ;;  %v254_v4 = vpop.f32.mrb[1].mxu1 }
 0x217   :  { %v291_v5 = vadd.f32 %v314_v1, %v254_v4 }
 0x218   :  { %294 = vst [vmem:[#allocation9 + $0x8] sm:$0xff] %v292_v3 }
 0x219   :  { %293 = vst [vmem:[#allocation9] sm:$0xff] %v291_v5 }
 0x21a   :  { %572 = shalt.err (!%p569_p0)
}
 0x21b   :  { %s573_s4 = scalar_lea.hbm %s703_s5, 256 }
 0x21c   :  { %p574_p1 = scmp.ne.s32.totalorder %s703_s5, %s573_s4  ;;  %p577_p2 = scmp.lt.u32.totalorder %s573_s4, %s703_s5 }
 0x21e   :  { %p579_p3 = pnand %p577_p2, %p574_p1 }
 0x220   :  { %582 = shalt.err (!%p579_p3)
}
 0x221   :  { %306 = dma.vmem_to_hbm [thread:$0]  %s301_s9, 256, %s703_s5, [#allocation5], %s591_s30, %s591_s30, %s592_s6  }
 0x222   :  { %587 = dma.done.wait [#allocation5], 256  }
 0x223   :  { %588 = vsyncadd [#allocation5], 4294967040 }
 0x224   :  { %310 = vsyncpa [#allocation4], 1 }
 0x225   :  { %311 = vsyncpa [#allocation7], 1 }
 0x226   :  { %312 = vsyncpa [#allocation5], 1 }

</bundles_post_ra>
